<compile_context>
chip_gen: v7x
topology: tpu7x:2x2x1
jax: 0.10.0
libtpu: 0.0.40
codegen_flags: <defaults>
</compile_context>

<pallas_src>
import functools

import jax
import jax.numpy as jnp
from jax import lax
from jax.experimental import pallas as pl
from jax.experimental.pallas import tpu as pltpu


def _gbn_kernel(x_ref, gamma_ref, beta_ref, o_ref, *, eps):
    """One grid step = K packed ghost batches x one feature tile.

    x_ref: (K, vb, Tc).  Stats reduce over axis=1 only (rows / sublanes);
    lane-padded garbage (partial feature tiles) never crosses lanes.
    """
    x = x_ref[...].astype(jnp.float32)                       # (K, vb, Tc)
    mean = jnp.mean(x, axis=1, keepdims=True)                # (K, 1, Tc)
    ex2 = jnp.mean(x * x, axis=1, keepdims=True)             # (K, 1, Tc)
    var = jnp.maximum(ex2 - mean * mean, 0.0)                # biased, one-pass
    gamma = gamma_ref[...].astype(jnp.float32)[None]         # (1, 1, Tc)
    beta = beta_ref[...].astype(jnp.float32)[None]           # (1, 1, Tc)
    a = lax.rsqrt(var + eps) * gamma                         # (K, 1, Tc)  EUP rsqrt
    b2 = beta - mean * a                                     # (K, 1, Tc)
    o_ref[...] = (x * a + b2).astype(o_ref.dtype)            # 2 VALU ops/elem


def _pick_tiling(num_chunks, vb, c, *, budget_bytes=4 << 20, target_rows=1024):
    """Choose (tile_c, k) for x blocks of shape (k, vb, tile_c).

    budget_bytes caps the f32 working copy of one tile; total per-step VMEM
    (2 in-bufs + 2 out-bufs + f32 copy) stays ~5x that, under vmem_limit.
    """
    elem = 4  # f32 working copy dominates
    # Prefer a full-width feature tile (fully contiguous DMA rows, and
    # tile_c == c is always layout-legal, even for C not a multiple of 128).
    if vb * c * elem <= budget_bytes:
        tile_c = c
    else:
        tile_c = max(128, (budget_bytes // (vb * elem) // 128) * 128)
        if tile_c >= c:
            tile_c = c

    # Pack K ghost batches per step: largest divisor of num_chunks in budget.
    max_rows = max(vb, budget_bytes // (tile_c * elem))
    k = 1
    for cand in range(1, num_chunks + 1):
        if num_chunks % cand:
            continue
        if cand * vb > max_rows:
            break
        k = cand
        if cand * vb >= target_rows:
            break

    # Keep >= 2 grid steps so both TensorCores (v7x megacore) get work.
    c_tiles = pl.cdiv(c, tile_c)
    if c_tiles * (num_chunks // k) < 2 and num_chunks >= 2:
        k = max(d for d in range(1, num_chunks // 2 + 1) if num_chunks % d == 0)
    return tile_c, k


def batch_norm_1d(x, weight, bias, *, virtual_batch_size=None, eps=1e-5):
    """Ghost BatchNorm1d forward (training mode), Pallas TPU kernel."""
    n, c = x.shape
    vb = n if virtual_batch_size is None else min(virtual_batch_size, n)
    assert n % vb == 0, "batch must be divisible by virtual_batch_size here"
    num_chunks = n // vb

    # Free row-major views; no padding, no extra HBM passes.
    x3 = x.reshape(num_chunks, vb, c)
    gamma = weight.reshape(1, c)
    beta = bias.reshape(1, c)

    tile_c, k = _pick_tiling(num_chunks, vb, c)
    c_tiles = pl.cdiv(c, tile_c)
    row_steps = num_chunks // k
    # Feature-tile axis OUTER so gamma/beta stay resident across inner steps.
    grid = (c_tiles, row_steps)

    itemsize = jnp.dtype(x.dtype).itemsize
    cost = pl.CostEstimate(
        flops=6 * n * c,
        transcendentals=num_chunks * c,
        bytes_accessed=2 * n * c * itemsize + 2 * c * jnp.dtype(weight.dtype).itemsize,
    )

    kernel = functools.partial(_gbn_kernel, eps=eps)
    out3 = pl.pallas_call(
        kernel,
        out_shape=jax.ShapeDtypeStruct((num_chunks, vb, c), x.dtype),
        grid_spec=pltpu.PrefetchScalarGridSpec(
            num_scalar_prefetch=0,
            grid=grid,
            in_specs=[
                pl.BlockSpec((k, vb, tile_c), lambda j, i: (i, 0, j)),  # x slab
                pl.BlockSpec((1, tile_c), lambda j, i: (0, j)),         # weight
                pl.BlockSpec((1, tile_c), lambda j, i: (0, j)),         # bias
            ],
            out_specs=pl.BlockSpec((k, vb, tile_c), lambda j, i: (i, 0, j)),
        ),
        compiler_params=pltpu.CompilerParams(
            dimension_semantics=("parallel", "parallel"),
            vmem_limit_bytes=48 << 20,
        ),
        cost_estimate=cost,
    )(x3, gamma, beta)

    return out3.reshape(n, c)


def _reference(x, weight, bias, *, virtual_batch_size=None, eps=1e-5):
    n, c = x.shape
    vb = n if virtual_batch_size is None else min(virtual_batch_size, n)
    chunks = []
    xf = x.astype(jnp.float32)
    for s in range(0, n, vb):
        xc = xf[s:s + vb]
        mean = xc.mean(axis=0, keepdims=True)
        var = ((xc - mean) ** 2).mean(axis=0, keepdims=True)
        xhat = (xc - mean) / jnp.sqrt(var + eps)
        chunks.append(xhat * weight[None, :] + bias[None, :])
    return jnp.concatenate(chunks, axis=0).astype(x.dtype)


if __name__ == "__main__":
    key = jax.random.PRNGKey(0)
    k_x, k_w, k_b, k_x2, k_w2, k_b2 = jax.random.split(key, 6)

    N, C = 16, 32          # batch, num_features
    VBS = 8                # virtual (ghost) batch size

    x = jax.random.normal(k_x, (N, C), dtype=jnp.float32)
    # nn.BatchNorm1d default init is weight=1, bias=0; perturb deterministically
    # so the affine path is exercised.
    weight = jnp.ones((C,), jnp.float32) + 0.1 * jax.random.normal(k_w, (C,))
    bias = 0.1 * jax.random.normal(k_b, (C,))

    # Ghost Batch Norm path (virtual_batch_size set)
    out_gbn = jax.block_until_ready(batch_norm_1d(x, weight, bias, virtual_batch_size=VBS))
    ref_gbn = _reference(x, weight, bias, virtual_batch_size=VBS)

    # Plain BatchNorm1d path (virtual_batch_size=None)
    out_bn = jax.block_until_ready(batch_norm_1d(x, weight, bias, virtual_batch_size=None))
    ref_bn = _reference(x, weight, bias, virtual_batch_size=None)

    # Non-128-multiple feature dim (no wrapper pad/slice needed).
    C2 = 40
    x2 = jax.random.normal(k_x2, (N, C2), dtype=jnp.float32)
    w2 = jnp.ones((C2,), jnp.float32) + 0.1 * jax.random.normal(k_w2, (C2,))
    b2 = 0.1 * jax.random.normal(k_b2, (C2,))
    out_odd = jax.block_until_ready(batch_norm_1d(x2, w2, b2, virtual_batch_size=VBS))
    ref_odd = _reference(x2, w2, b2, virtual_batch_size=VBS)

    assert out_gbn.shape == (N, C) and out_bn.shape == (N, C) and out_odd.shape == (N, C2)
    assert jnp.allclose(out_gbn, ref_gbn, atol=1e-5, rtol=1e-5)
    assert jnp.allclose(out_bn, ref_bn, atol=1e-5, rtol=1e-5)
    assert jnp.allclose(out_odd, ref_odd, atol=1e-5, rtol=1e-5)
    print("KERNEL_OK")
</pallas_src>

<mosaic_0001>
module attributes {stable_mosaic.version = 11 : i64} {
  func.func @_gbn_kernel(%arg0: i32, %arg1: i32, %arg2: memref<1x8x32xf32, #tpu.memory_space<vmem>>, %arg3: memref<1x32xf32, #tpu.memory_space<vmem>>, %arg4: memref<1x32xf32, #tpu.memory_space<vmem>>, %arg5: memref<1x8x32xf32, #tpu.memory_space<vmem>>) attributes {dimension_semantics = [#tpu.dimension_semantics<parallel>, #tpu.dimension_semantics<parallel>], iteration_bounds = array<i64: 1, 2>, scalar_prefetch = 0 : i64, scratch_operands = 0 : i64, tpu.core_type = #tpu.core_type<tc>, window_params = [{transform_indices = @transform_0, window_bounds = array<i64: 1, 8, 32>}, {transform_indices = @transform_1, window_bounds = array<i64: 1, 32>}, {transform_indices = @transform_2, window_bounds = array<i64: 1, 32>}, {transform_indices = @transform_3, window_bounds = array<i64: 1, 8, 32>}]} {
    %c0 = arith.constant 0 : index
    %c0_0 = arith.constant 0 : index
    %c0_1 = arith.constant 0 : index
    %0 = vector.load %arg2[%c0, %c0_0, %c0_1] : memref<1x8x32xf32, #tpu.memory_space<vmem>>, vector<1x8x32xf32>
    %cst = arith.constant dense<0.000000e+00> : vector<1x32xf32>
    %1 = vector.multi_reduction <add>, %0, %cst [1] : vector<1x8x32xf32> to vector<1x32xf32>
    %2 = vector.shape_cast %1 : vector<1x32xf32> to vector<1x1x32xf32>
    %cst_2 = arith.constant 8.000000e+00 : f32
    %3 = vector.broadcast %cst_2 : f32 to vector<1x1x32xf32>
    %4 = arith.divf %2, %3 : vector<1x1x32xf32>
    %5 = arith.mulf %0, %0 : vector<1x8x32xf32>
    %cst_3 = arith.constant dense<0.000000e+00> : vector<1x32xf32>
    %6 = vector.multi_reduction <add>, %5, %cst_3 [1] : vector<1x8x32xf32> to vector<1x32xf32>
    %7 = vector.shape_cast %6 : vector<1x32xf32> to vector<1x1x32xf32>
    %cst_4 = arith.constant 8.000000e+00 : f32
    %8 = vector.broadcast %cst_4 : f32 to vector<1x1x32xf32>
    %9 = arith.divf %7, %8 : vector<1x1x32xf32>
    %10 = arith.mulf %4, %4 : vector<1x1x32xf32>
    %11 = arith.subf %9, %10 : vector<1x1x32xf32>
    %cst_5 = arith.constant 0.000000e+00 : f32
    %12 = vector.broadcast %cst_5 : f32 to vector<1x1x32xf32>
    %13 = arith.maximumf %11, %12 : vector<1x1x32xf32>
    %c0_6 = arith.constant 0 : index
    %c0_7 = arith.constant 0 : index
    %14 = vector.load %arg3[%c0_6, %c0_7] : memref<1x32xf32, #tpu.memory_space<vmem>>, vector<1x32xf32>
    %15 = vector.shape_cast %14 : vector<1x32xf32> to vector<1x1x32xf32>
    %c0_8 = arith.constant 0 : index
    %c0_9 = arith.constant 0 : index
    %16 = vector.load %arg4[%c0_8, %c0_9] : memref<1x32xf32, #tpu.memory_space<vmem>>, vector<1x32xf32>
    %17 = vector.shape_cast %16 : vector<1x32xf32> to vector<1x1x32xf32>
    %cst_10 = arith.constant 9.99999974E-6 : f32
    %18 = vector.broadcast %cst_10 : f32 to vector<1x1x32xf32>
    %19 = arith.addf %13, %18 : vector<1x1x32xf32>
    %20 = math.rsqrt %19 : vector<1x1x32xf32>
    %21 = arith.mulf %20, %15 : vector<1x1x32xf32>
    %22 = arith.mulf %4, %21 : vector<1x1x32xf32>
    %23 = arith.subf %17, %22 : vector<1x1x32xf32>
    %24 = vector.broadcast %21 : vector<1x1x32xf32> to vector<1x8x32xf32>
    %25 = arith.mulf %0, %24 : vector<1x8x32xf32>
    %26 = vector.broadcast %23 : vector<1x1x32xf32> to vector<1x8x32xf32>
    %27 = arith.addf %25, %26 : vector<1x8x32xf32>
    %c0_11 = arith.constant 0 : index
    %c0_12 = arith.constant 0 : index
    %c0_13 = arith.constant 0 : index
    %28 = vector.load %arg5[%c0_11, %c0_12, %c0_13] : memref<1x8x32xf32, #tpu.memory_space<vmem>>, vector<1x8x32xf32>
    tpu.vector_store %arg5[%c0_11, %c0_12, %c0_13], %27 {strides = array<i32>} : memref<1x8x32xf32, #tpu.memory_space<vmem>>, vector<1x8x32xf32>,
    return
  }
  func.func @transform_0(%arg0: i32, %arg1: i32) -> (i32, i32, i32) {
    %c0_i32 = arith.constant 0 : i32
    %c0_i32_0 = arith.constant 0 : i32
    return %arg1, %c0_i32, %arg0 : i32, i32, i32
  }
  func.func @transform_1(%arg0: i32, %arg1: i32) -> (i32, i32) {
    %c0_i32 = arith.constant 0 : i32
    %c0_i32_0 = arith.constant 0 : i32
    return %c0_i32, %arg0 : i32, i32
  }
  func.func @transform_2(%arg0: i32, %arg1: i32) -> (i32, i32) {
    %c0_i32 = arith.constant 0 : i32
    %c0_i32_0 = arith.constant 0 : i32
    return %c0_i32, %arg0 : i32, i32
  }
  func.func @transform_3(%arg0: i32, %arg1: i32) -> (i32, i32, i32) {
    %c0_i32 = arith.constant 0 : i32
    %c0_i32_0 = arith.constant 0 : i32
    return %arg1, %c0_i32, %arg0 : i32, i32, i32
  }
}

</mosaic_0001>

<bundles_post_ra>
// kernel: tpu_custom_call.1
= control target key start
LH: loop header
LB: loop body
LE: loop exit
PB: predicated region body
PF: predicated region fallthrough
CT: control target
= control target key end

     0   :  { %8 = vsyncpa [#allocation3], 0  ;;  %s793_s0 = inlined_call_operand.hbm [shape: f32[2,8,32], index: 0, kind: input, shape index: {}]   ;;  %s794_s1 = inlined_call_operand.vmem [shape: f32[1,32], index: 1, kind: input, shape index: {}]   ;;  %s795_s2 = inlined_call_operand.vmem [shape: f32[1,32], index: 2, kind: input, shape index: {}]   ;;  %s796_s3 = inlined_call_operand.hbm [shape: f32[2,8,32], index: 3, kind: output, shape index: {}]  }
   0x1   :  { %10 = vsyncpa [#allocation3 + $0x1], 0 }
   0x2   :  { %11 = vsyncpa [#allocation4], 0 }
   0x3   :  { %13 = vsyncpa [#allocation4 + $0x1], 0  ;;  %s608_s12 = smov 0   ;;  %s610_s13 = smov 0  }
   0x4   :  { %s612_s14 = smov 0   ;;  %s614_s15 = smov 0  }
   0x5   :  { %s616_s16 = smov 0   ;;  %s618_s17 = smov 0  }
   0x6 LB: > { %s393_s18 = sadd.s32 4294967295, %s584_s17   ;;  %s394_s19 = sadd.s32 4294967294, %s584_s17   ;;  %s584_s17 = sphi %s618_s17, %s19_s17   ;;  %s580_s16 = sphi %s616_s16, %s812_s16   ;;  %s576_s15 = sphi %s614_s15, %s811_s15   ;;  %s572_s14 = sphi %s612_s14, %s810_s14   ;;  %s568_s13 = sphi %s610_s13, %s809_s13   ;;  %s564_s12 = sphi %s608_s12, %s808_s12  }
   0x7   : > { %s28_s20 = sadd.s32 1, %s580_s16  ;;  %s40_s21 = sadd.s32 1, %s572_s14 }
   0x8   : > { %p29_p0 = scmp.ge.s32.totalorder %s28_s20, 2  ;;  %p47_p1 = scmp.ne.s32.totalorder %s572_s14, %s568_s13 }
   0x9   : > { %p48_p2 = scmp.eq.s32.totalorder %s584_s17, 0  ;;  %p53_p3 = scmp.ne.s32.totalorder %s568_s13, %s564_s12 }
   0xa   : > { %s814_s20 = smov (%p29_p0, %s28_s20), 0  ;;  %p54_p5 = scmp.eq.s32.totalorder %s393_s18, 0 }
   0xb   : > { %p649_p4 = por %p48_p2, %p47_p1  ;;  %s35_s23 = ssub.s32 %s580_s16, %s814_s20 }
   0xc   : > { %p131_p6 = scmp.eq.s32.totalorder %s393_s18, 1  ;;  %p38_p7 = scmp.eq.s32.totalorder %s35_s23, 0 }
   0xd   : > { %p655_p8 = por %p54_p5, %p53_p3  ;;  %p137_p10 = scmp.eq.s32.totalorder %s394_s19, 1 }
   0xe   : > { %p659_p9 = por %p131_p6, %p47_p1  ;;  %p420_p13 = scmp.lt.s32.totalorder %s584_s17, 2 }
   0xf   : > { %s664_s26 = scalar_select %p38_p7, %s572_s14, %s40_s21  }
  0x10   : > { %s800_s25 = scalar_select %p659_p9, 1, 0 }
  0x11   : > { %p666_p11 = por %p137_p10, %p53_p3  ;;  %s169_s28 = sand.u32 1, %s572_s14  }
  0x12   : > { %s399_s29 = sshll.u32 %s169_s28, 3  ;;  %s400_s30 = sshll.u32 %s580_s16, 7 }
  0x13   : > { %s801_s27 = scalar_select %p666_p11, 1, 0 }
  0x14   : > { %s677_s6 = scalar_lea.hbm %s793_s0, %s400_s30  ;;  %s173_s7 = scalar_lea.vmem [#allocation2], %s399_s29 }
  0x15   : > { %s181_s8 = sshll.u32 %s173_s7, 4  ;;  %p683_p0 = pnand %p420_p13, %p649_p4  ;;  %s679_s8 = int_to_ptr.vmem [resolvable:$true] %s181_s8 }
  0x16   : > { %s170_s10 = scalar_lea.sflag [#allocation3], %s169_s28  ;;  %s472_s11 = scalar_lea.hbm %s677_s6, 128 }
  0x17   : > { %p473_p3 = scmp.ne.s32.totalorder %s677_s6, %s472_s11  ;;  %p474_p5 = pneg %p683_p0 }
  0x18   : > { %s477_s21 = scalar_lea.hbm %s793_s0, 256  ;;  %p478_p4 = scmp.lt.u32.totalorder %s677_s6, %s793_s0 }
  0x19   : > { %p475_p6 = pnand %p474_p5, %p473_p3  ;;  %p479_p10 = scmp.lt.u32.totalorder %s477_s21, %s472_s11 }
  0x1a   : > { %p481_p12 = scmp.lt.u32.totalorder %s472_s11, %s677_s6 }
  0x1b   : > { %p476_p7 = pneg %p475_p6  ;;  %p480_p13 = por %p479_p10, %p478_p4 }
  0x1d   : > { %p482_p1 = por %p481_p12, %p480_p13 }
  0x1f   : > { %p483_p2 = pnand %p482_p1, %p476_p7 }
  0x21   : > { %486 = shalt.err (!%p483_p2)
}
  0x22   : > { %s487_s28 = scalar_lea.vmem %s679_s8, 128  ;;  %s586_s29 = smov [#allocation2]  }
  0x23   : > { %p488_p3 = scmp.ne.s32.totalorder %s679_s8, %s487_s28  ;;  %s492_s30 = sshll.u32 %s586_s29, 4  ;;  %s493_s30 = int_to_ptr.vmem [resolvable:$false] %s492_s30 }
  0x24   : > { %s494_s4 = scalar_lea.vmem %s493_s30, 256  ;;  %p495_p9 = scmp.lt.s32.totalorder %s679_s8, %s493_s30 }
  0x25   : > { %p490_p6 = pnand %p488_p3, %p474_p5  ;;  %p496_p4 = scmp.lt.s32.totalorder %s494_s4, %s487_s28 }
  0x27   : > { %p491_p11 = pneg %p490_p6  ;;  %p497_p10 = por %p496_p4, %p495_p9 }
  0x29   : > { %p498_p12 = pnand %p497_p10, %p491_p11 }
  0x2b   : > { %501 = shalt.err (!%p498_p12)
}
  0x2c   : > { %415 = dma.hbm_to_vmem [thread:$0]  (!%p683_p0), %s677_s6, 128, %s679_s8, %s170_s10  }
  0x2d   : > { %p803_p1 = scmp.lt.s32.totalorder %s584_s17, 3  ;;  %p804_p2 = scmp.ge.s32.totalorder %s584_s17, 1 }
  0x2f   : > { %p187_p5 = pnand %p804_p2, %p803_p1 }
  0x30   : > { %s719_s5 = sand.u32 (!%p187_p5), 1, %s568_s13  }
  0x31   : > { %190 = sbr.rel (%p187_p5) target bundleno = 116 (0x74), region = 32  ;;  %s402_s7 = sshll.u32 (!%p187_p5), %s719_s5, 3 }
  0x32   : > { %s193_s11 = scalar_lea.sflag (!%p187_p5), [#allocation3], %s719_s5  ;;  %s196_s9 = scalar_lea.vmem (!%p187_p5), [#allocation2], %s402_s7 }
  0x38   : > { %555 = dma.done.wait (%p655_p8), %s193_s11, 128  }
  0x39   : > { %557 = vsyncadd (%p655_p8), %s193_s11, 4294967168  ;;  %vm232_vm0 = vcmask 261120   ;;  %v231_v0 = vld [vmem:[%s196_s9] sm:$0xff]  ;;  %v261_v22 = vlaneseq  ;;  %s224_s18 = scalar_lea.vmem [#allocation5], %s402_s7  ;;  %s405_s21 = sshll.u32 %s576_s15, 7 }
  0x3a   : > { %v233_v1 = vsel %vm232_vm0, %v231_v0, 0.0  ;;  %v242_v2 = vmul.f32 %v231_v0, %v231_v0  ;;  %v254_v24 = vld [vmem:[%s794_s1] sm:$0x1]  ;;  %s289_s19 = sshll.u32 %s224_s18, 4  ;;  %s745_s28 = scalar_lea.hbm %s796_s3, %s405_s21  ;;  %s740_s19 = int_to_ptr.vmem [resolvable:$true] %s289_s19 }
  0x3b   : > { %v234_v3 = vrot.slane %v233_v1, 4  ;;  %v262_v23 = vshrl.u32 %v261_v22, 7  ;;  %v255_v28 = vld [vmem:[%s795_s2] sm:$0x1]  ;;  %s275_s29 = scalar_lea.sflag [#allocation4], %s719_s5  ;;  %s502_s30 = scalar_lea.vmem %s740_s19, 128 }
  0x3c   : > { %v243_v4 = vsel %vm232_vm0, %v242_v2, 0.0  ;;  %p503_p8 = scmp.ne.s32.totalorder %s740_s19, %s502_s30  ;;  %p805_p9 = scmp.ne.s32.totalorder %s800_s25, 0 }
  0x3d   : > { %v235_v5 = vadd.f32 %v234_v3, %v233_v1  ;;  %v244_v6 = vrot.slane %v243_v4, 4  ;;  %v263_v25 = vsub.s32 0, %v262_v23  ;;  %s587_s15 = smov [#allocation5]  }
  0x3e   : > { %p504_p11 = pnand %p503_p8, %p805_p9  ;;  %s506_s4 = sshll.u32 %s587_s15, 4  ;;  %s507_s4 = int_to_ptr.vmem [resolvable:$false] %s506_s4 }
  0x3f   : > { %v236_v7 = vrot.slane %v235_v5, 2  ;;  %v245_v8 = vadd.f32 %v244_v6, %v243_v4  ;;  %s508_s7 = scalar_lea.vmem %s507_s4, 256  ;;  %p509_p7 = scmp.lt.s32.totalorder %s740_s19, %s507_s4 }
  0x40   : > { %p505_p0 = pneg %p504_p11  ;;  %p510_p13 = scmp.lt.s32.totalorder %s508_s7, %s502_s30 }
  0x41   : > { %v237_v9 = vadd.f32 %v236_v7, %v235_v5  ;;  %v246_v10 = vrot.slane %v245_v8, 2 }
  0x42   : > { %p511_p3 = por %p510_p13, %p509_p7 }
  0x43   : > { %v238_v11 = vrot.slane %v237_v9, 1  ;;  %v247_v12 = vadd.f32 %v246_v10, %v245_v8 }
  0x44   : > { %p512_p6 = pnand %p511_p3, %p505_p0 }
  0x45   : > { %v239_v13 = vadd.f32 %v238_v11, %v237_v9  ;;  %v248_v14 = vrot.slane %v247_v12, 1 }
  0x47   : > { %v241_v15 = vmul.f32 0.125, %v239_v13  ;;  %v249_v16 = vadd.f32 %v248_v14, %v247_v12 }
  0x49   : > { %v250_v17 = vmul.f32 0.125, %v249_v16  ;;  %v251_v18 = vmul.f32 %v241_v15, %v241_v15 }
  0x4b   : > { %v252_v19 = vsub.f32 %v250_v17, %v251_v18 }
  0x4d   : > { %v253_v20 = vmax.f32 %v252_v19, 0.0 }
  0x4f   : > { %v256_v21 = vadd.f32 1e-05, %v253_v20 }
  0x51   : > { %470 = vrsqrt.f32 %v256_v21 }
  0x5b   : > { %v471_v26 = vpop.eup %470 }
  0x5c   : > { %v258_v27 = vmul.f32 %v471_v26, %v254_v24 }
  0x5e   : > { %v259_v29 = vmul.f32 %v258_v27, %v241_v15  ;;  %v264_v30 = vrot.slane %v258_v27, %v263_v25 }
  0x60   : > { %v260_v31 = vsub.f32 %v255_v28, %v259_v29  ;;  %v265_v32 = vmul.f32 %v264_v30, %v231_v0 }
  0x62   : > { %v270_v33 = vrot.slane %v260_v31, %v263_v25 }
  0x64   : > { %v272_v34 = vadd.f32 %v270_v33, %v265_v32 }
  0x66   : > { %273 = vst.msk [vmem:[%s224_s18] sm:$0xff] %vm232_vm0, %v272_v34 }
  0x67   : > { %515 = shalt.err (!%p512_p6)
}
  0x68   : > { %s516_s5 = scalar_lea.hbm %s745_s28, 128  ;;  %s520_s24 = scalar_lea.hbm %s796_s3, 256 }
  0x69   : > { %p517_p4 = scmp.ne.s32.totalorder %s745_s28, %s516_s5  ;;  %p521_p1 = scmp.lt.u32.totalorder %s745_s28, %s796_s3 }
  0x6a   : > { %p522_p2 = scmp.lt.u32.totalorder %s520_s24, %s516_s5  ;;  %p524_p8 = scmp.lt.u32.totalorder %s516_s5, %s745_s28 }
  0x6b   : > { %p518_p10 = pnand %p517_p4, %p805_p9 }
  0x6c   : > { %p523_p5 = por %p522_p2, %p521_p1 }
  0x6d   : > { %p519_p12 = pneg %p518_p10 }
  0x6e   : > { %p525_p11 = por %p524_p8, %p523_p5 }
  0x70   : > { %p526_p0 = pnand %p525_p11, %p519_p12 }
  0x72   : > { %529 = shalt.err (!%p526_p0)
}
  0x73   : > { %410 = dma.vmem_to_hbm [thread:$0]  (%p805_p9), %s740_s19, 128, %s745_s28, %s275_s29  }
  0x74 PF: > { %s301_s10 = sand.u32 1, %s564_s12   ;;  %p806_p7 = scmp.ne.s32.totalorder %s801_s27, 0 }
  0x75   : > { %p807_p13 = scmp.ge.s32.totalorder %s584_s17, 2  ;;  %s302_s18 = scalar_lea.sflag [#allocation4], %s301_s10 }
  0x77   : > { %p417_p3 = pnand %p807_p13, %p806_p7 }
  0x79   : > { %559 = dma.done.wait (!%p417_p3), %s302_s18, 128  }
  0x7a   : > { %561 = vsyncadd (!%p417_p3), %s302_s18, 4294967168  ;;  %s19_s17 = sadd.s32 1, %s584_s17   ;;  %s808_s12 = smov %s568_s13 }
  0x7b   : > { %p16_p6 = scmp.ge.s32.totalorder %s19_s17, 4   ;;  %s809_s13 = smov %s572_s14 }
  0x7c   : > { %s810_s14 = smov %s664_s26  ;;  %s811_s15 = smov %s580_s16 }
  0x7d   : > { %s812_s16 = smov %s814_s20  ;;  %18 = sbr.rel (!%p16_p6) target bundleno = 6 (0x6), region = 83 }
  0x84   :  { %307 = vsyncpa [#allocation3], 1 }
  0x85   :  { %309 = vsyncpa [#allocation3 + $0x1], 1 }
  0x86   :  { %310 = vsyncpa [#allocation4], 1 }
  0x87   :  { %312 = vsyncpa [#allocation4 + $0x1], 1 }

</bundles_post_ra>
